<compile_context>
chip_gen: v7x
topology: tpu7x:2x2x1
jax: 0.10.0
libtpu: 0.0.40
codegen_flags: <defaults>
</compile_context>

<pallas_src>
import functools

import jax
import jax.numpy as jnp
from jax import lax
from jax.experimental import pallas as pl
from jax.experimental.pallas import tpu as pltpu


def _round_up(x, m):
    return ((x + m - 1) // m) * m


def _apply_act(acc, negative_slope):
    if negative_slope == 0.0:
        return jnp.maximum(acc, 0.0)          # ReLU
    return jnp.maximum(acc, acc * negative_slope)  # LeakyReLU (0 < slope < 1)


def _conv_kernel(x_ref, w_ref, b_ref, o_ref, *, negative_slope):
    # Single-pass kernel: the whole K = 9*Cin reduction in one MXU matmul.
    # x_ref: (bm, K)  w_ref: (K, bn)  b_ref: (1, bn)  o_ref: (bm, bn)
    acc = jnp.dot(x_ref[...], w_ref[...], preferred_element_type=jnp.float32)
    acc = acc + b_ref[...]                    # (1, bn) broadcasts over rows
    o_ref[...] = _apply_act(acc, negative_slope).astype(o_ref.dtype)


def _conv_kernel_ktiled(x_ref, w_ref, b_ref, o_ref, acc_ref, *, negative_slope):
    # K-tiled kernel: f32 VMEM accumulator, init/finalize gated with pl.when.
    @pl.when(pl.program_id(2) == 0)
    def _():
        acc_ref[...] = jnp.zeros_like(acc_ref)

    acc_ref[...] += jnp.dot(x_ref[...], w_ref[...],
                            preferred_element_type=jnp.float32)

    @pl.when(pl.program_id(2) == pl.num_programs(2) - 1)
    def _():
        acc = acc_ref[...] + b_ref[...]
        o_ref[...] = _apply_act(acc, negative_slope).astype(o_ref.dtype)


# ~40 MiB scoped-VMEM budget: fits v7x's 64 MiB physical VMEM with headroom and
# is well inside v5e/v6e's 128 MiB, so one tile table works on all generations.
_DEFAULT_VMEM_BUDGET = 40 * 1024 * 1024
_VMEM_MARGIN = 8 * 1024 * 1024


def _vmem_need(block_m, block_k, block_n, in_item, out_item, k_tiled):
    need = (2 * block_m * block_k * in_item      # im2col block (double-buffered)
            + 2 * block_k * block_n * in_item    # weight block (double-buffered)
            + 2 * block_n * 4                    # f32 bias block
            + 2 * block_m * block_n * out_item)  # output block (double-buffered)
    if k_tiled:
        need += block_m * block_n * 4            # f32 accumulator scratch
    return need


def _pick_block_m(M, requested):
    if requested is not None:
        return max(8, _round_up(requested, 8))   # sublane constraint: % 8 == 0
    # As large as possible (amortize ~0.35us/step, approach the HBM roofline)
    # while keeping >= 4 grid steps so the pipeline has depth and the
    # "parallel" row axis can shard across v7x's 2 TensorCores.
    return int(min(512, max(128, (M // 4) // 128 * 128)))


def _pick_channel_tiles(K, Cout, block_m, in_item, out_item, budget,
                        block_n=None, block_k=None):
    """Choose (K_pad, Cout_pad, block_n, block_k, k_tiled) under a VMEM budget."""
    cout128 = _round_up(Cout, 128)

    if block_n is not None:
        bn_list = [_round_up(block_n, 128)]
    elif cout128 <= 512:
        bn_list = [cout128]
    else:
        bn_list = [b for b in (512, 256, 128) if cout128 % b == 0]

    if block_k is None:
        bk_list = [None, 1024, 512, 256, 128]    # None = K untiled
    elif block_k >= K:
        bk_list = [None]
    else:
        bk_list = [_round_up(block_k, 128)]      # lane constraint: % 128 == 0

    chosen = (bk_list[-1], bn_list[-1])
    for bk in bk_list:
        fits = False
        for bn in bn_list:
            k_tiled = bk is not None
            eff_bk = bk if k_tiled else K
            chosen = (bk, bn)
            if _vmem_need(block_m, eff_bk, bn, in_item, out_item, k_tiled) <= budget:
                fits = True
                break
        if fits:
            break

    bk, bn = chosen
    k_tiled = bk is not None
    K_pad = _round_up(K, bk) if k_tiled else K
    Cout_pad = _round_up(cout128, bn)
    return K_pad, Cout_pad, bn, (bk if k_tiled else K), k_tiled


def conv_relu_pallas(x, weight, bias, *, activate="relu",
                     compute_dtype=jnp.bfloat16,
                     block_m=None, block_n=None, block_k=None,
                     channels_last=False,
                     vmem_budget_bytes=_DEFAULT_VMEM_BUDGET):
    """CONV module forward: 3x3 conv (stride=1, pad=1) + bias + ReLU/LeakyReLU.

    x: (N, Cin, H, W) if channels_last=False (PyTorch NCHW), else (N, H, W, Cin).
    weight: (Cout, Cin, 3, 3) (PyTorch OIHW); bias: (Cout,).
    compute_dtype: MXU operand dtype.  bf16 (default) is MXU-native on
      v5e/v6e/v7x and halves the im2col HBM traffic; accumulation is always
      f32.  Pass jnp.float32 for exact f32 conv parity.
    Returns the caller's layout (NCHW by default) in the dtype of x.
    """
    if activate == "relu":
        negative_slope = 0.0
    elif activate == "lrelu":
        negative_slope = 0.01
    else:
        raise NotImplementedError("wrong")
    # TODO(synk): use_bn=True (BatchNorm2d) not implemented; fold eval-mode BN
    # scale/shift into weight/bias upstream if needed.

    if channels_last:
        N, H, W, Cin = x.shape
    else:
        N, Cin, H, W = x.shape
    Cout = weight.shape[0]
    out_dtype = x.dtype
    compute_dtype = jnp.dtype(compute_dtype)

    K = 9 * Cin
    M = N * H * W
    bm = _pick_block_m(M, block_m)
    M_pad = _round_up(M, bm)

    in_item = compute_dtype.itemsize
    # Store the kernel output in the narrower compute dtype when the caller's
    # dtype is wider: the padded (M_pad, Cout_pad) slab is the largest HBM
    # stream, so this halves its writeback and the re-read by the final slice.
    store_dtype = (compute_dtype if in_item < jnp.dtype(out_dtype).itemsize
                   else jnp.dtype(out_dtype))
    out_item = store_dtype.itemsize

    K_pad, Cout_pad, bn, bk, k_tiled = _pick_channel_tiles(
        K, Cout, bm, in_item, out_item, vmem_budget_bytes,
        block_n=block_n, block_k=block_k)

    # ---- XLA-side glue: cast FIRST (so the 9x-inflated im2col matrix is never
    # materialized in f32), then NHWC, pad=1, im2col with all 9 taps in K. ----
    # TODO(synk): for large activations, replace the wrapper-side im2col with an
    # in-kernel halo scheme (row-block DMA of (rows+2, W+2, Cin) + 9 shifted
    # accumulating MXU matmuls) to remove the ~9x HBM inflation of the patch
    # matrix; for small Cin the im2col/matmul form remains the better layout.
    x_c = x.astype(compute_dtype)
    x_nhwc = x_c if channels_last else jnp.transpose(x_c, (0, 2, 3, 1))
    x_sp = jnp.pad(x_nhwc, ((0, 0), (1, 1), (1, 1), (0, 0)))
    patches = [x_sp[:, dy:dy + H, dx:dx + W, :]
               for dy in range(3) for dx in range(3)]
    cols = jnp.concatenate(patches, axis=-1).reshape(M, K)
    cols = jnp.pad(cols, ((0, M_pad - M), (0, K_pad - K)))

    # weight (Cout, Cin, kh, kw) -> (kh, kw, Cin, Cout) -> (K_pad, Cout_pad);
    # tap/channel order matches the im2col concat order above.
    w_flat = jnp.transpose(weight, (2, 3, 1, 0)).reshape(K, Cout)
    w_flat = jnp.pad(w_flat.astype(compute_dtype),
                     ((0, K_pad - K), (0, Cout_pad - Cout)))
    b_pad = jnp.pad(bias.astype(jnp.float32),
                    (0, Cout_pad - Cout)).reshape(1, Cout_pad)

    grid_m = M_pad // bm
    grid_n = Cout_pad // bn

    # Advisory cost: real (unpadded) flops; bytes in the dtypes actually DMA'd.
    flops = 2 * M * K * Cout
    bytes_accessed = (M_pad * K_pad * in_item + K_pad * Cout_pad * in_item
                      + Cout_pad * 4 + M_pad * Cout_pad * out_item)
    vmem_limit = int(min(100 * 1024 * 1024,
                         max(32 * 1024 * 1024,
                             _vmem_need(bm, bk, bn, in_item, out_item, k_tiled)
                             + _VMEM_MARGIN)))

    # TODO(synk): the weight/bias blocks are grid-invariant along the row axis;
    # pipeline_mode=pl.Buffered(1) on those specs would halve their VMEM
    # footprint (left out here: channel/K tiling already bounds it).
    if not k_tiled:
        kernel = functools.partial(_conv_kernel, negative_slope=negative_slope)
        grid = (grid_m, grid_n)
        in_specs = [
            pl.BlockSpec((bm, K_pad), lambda i, j: (i, 0)),
            pl.BlockSpec((K_pad, bn), lambda i, j: (0, j)),
            pl.BlockSpec((1, bn), lambda i, j: (0, j)),
        ]
        out_specs = pl.BlockSpec((bm, bn), lambda i, j: (i, j))
        scratch_shapes = []
        dim_sem = ("parallel", "parallel")
    else:
        kernel = functools.partial(_conv_kernel_ktiled,
                                   negative_slope=negative_slope)
        grid_k = K_pad // bk
        grid = (grid_m, grid_n, grid_k)
        in_specs = [
            pl.BlockSpec((bm, bk), lambda i, j, k: (i, k)),
            pl.BlockSpec((bk, bn), lambda i, j, k: (k, j)),
            pl.BlockSpec((1, bn), lambda i, j, k: (0, j)),
        ]
        out_specs = pl.BlockSpec((bm, bn), lambda i, j, k: (i, j))
        scratch_shapes = [pltpu.VMEM((bm, bn), jnp.float32)]
        dim_sem = ("parallel", "parallel", "arbitrary")

    out_flat = pl.pallas_call(
        kernel,
        out_shape=jax.ShapeDtypeStruct((M_pad, Cout_pad), store_dtype),
        grid_spec=pltpu.PrefetchScalarGridSpec(
            num_scalar_prefetch=0,
            grid=grid,
            in_specs=in_specs,
            out_specs=out_specs,
            scratch_shapes=scratch_shapes),
        compiler_params=pltpu.CompilerParams(
            dimension_semantics=dim_sem,
            vmem_limit_bytes=vmem_limit),
        cost_estimate=pl.CostEstimate(
            flops=flops, transcendentals=0, bytes_accessed=bytes_accessed),
    )(cols, w_flat, b_pad)

    # Strip padding; restore the caller's layout and dtype.
    out = out_flat[:M, :Cout].astype(out_dtype).reshape(N, H, W, Cout)
    if channels_last:
        return out
    return jnp.transpose(out, (0, 3, 1, 2))


def _ref_conv_relu(x, weight, bias):
    y = lax.conv_general_dilated(
        x, weight, window_strides=(1, 1), padding=((1, 1), (1, 1)),
        dimension_numbers=("NCHW", "OIHW", "NCHW"))
    return jnp.maximum(y + bias[None, :, None, None], 0.0)


if __name__ == "__main__":
    key = jax.random.PRNGKey(0)
    k_x, k_w, k_b, k_x2, k_w2, k_b2 = jax.random.split(key, 6)

    # Small shapes consistent with the module (NCHW, 3x3 conv, same padding).
    N, Cin, Cout, H, W = 2, 4, 8, 16, 16
    x = jax.random.normal(k_x, (N, Cin, H, W), dtype=jnp.float32)
    weight = jax.random.normal(k_w, (Cout, Cin, 3, 3), dtype=jnp.float32) * 0.1
    bias = jax.random.normal(k_b, (Cout,), dtype=jnp.float32) * 0.1
    ref = _ref_conv_relu(x, weight, bias)

    # 1) f32 operand path: exact parity with the nn.Conv2d + ReLU semantics.
    out_f32 = jax.block_until_ready(
        conv_relu_pallas(x, weight, bias, compute_dtype=jnp.float32))
    assert out_f32.shape == (N, Cout, H, W)
    assert jnp.allclose(out_f32, ref, rtol=1e-4, atol=1e-4)

    # 2) Default path: bf16 MXU operands + bf16 output store, f32 accumulate.
    out_bf16 = jax.block_until_ready(conv_relu_pallas(x, weight, bias))
    assert jnp.allclose(out_bf16, ref, rtol=5e-2, atol=5e-2)

    # 3) channels_last path (skips both NCHW<->NHWC HBM relayouts).
    out_nhwc = jax.block_until_ready(
        conv_relu_pallas(jnp.transpose(x, (0, 2, 3, 1)), weight, bias,
                         compute_dtype=jnp.float32, channels_last=True))
    assert jnp.allclose(out_nhwc, jnp.transpose(ref, (0, 2, 3, 1)),
                        rtol=1e-4, atol=1e-4)

    # 4) Channel/K-tiled path (f32 accumulator kernel), forced small tiles.
    N2, Cin2, Cout2 = 2, 32, 64
    x2 = jax.random.normal(k_x2, (N2, Cin2, H, W), dtype=jnp.float32)
    w2 = jax.random.normal(k_w2, (Cout2, Cin2, 3, 3), dtype=jnp.float32) * 0.05
    b2 = jax.random.normal(k_b2, (Cout2,), dtype=jnp.float32) * 0.1
    ref2 = _ref_conv_relu(x2, w2, b2)
    out2 = jax.block_until_ready(
        conv_relu_pallas(x2, w2, b2, compute_dtype=jnp.float32,
                         block_m=256, block_k=128))
    assert out2.shape == (N2, Cout2, H, W)
    assert jnp.allclose(out2, ref2, rtol=1e-3, atol=1e-3)

    print("KERNEL_OK")
</pallas_src>

<mosaic_0001>
module attributes {stable_mosaic.version = 11 : i64} {
  func.func @_conv_kernel(%arg0: i32, %arg1: i32, %arg2: memref<128x36xf32, #tpu.memory_space<vmem>>, %arg3: memref<36x128xf32, #tpu.memory_space<vmem>>, %arg4: memref<1x128xf32, #tpu.memory_space<vmem>>, %arg5: memref<128x128xf32, #tpu.memory_space<vmem>>) attributes {dimension_semantics = [#tpu.dimension_semantics<parallel>, #tpu.dimension_semantics<parallel>], iteration_bounds = array<i64: 4, 1>, scalar_prefetch = 0 : i64, scratch_operands = 0 : i64, tpu.core_type = #tpu.core_type<tc>, window_params = [{transform_indices = @transform_0, window_bounds = array<i64: 128, 36>}, {transform_indices = @transform_1, window_bounds = array<i64: 36, 128>}, {transform_indices = @transform_2, window_bounds = array<i64: 1, 128>}, {transform_indices = @transform_3, window_bounds = array<i64: 128, 128>}]} {
    %c0 = arith.constant 0 : index
    %c0_0 = arith.constant 0 : index
    %0 = vector.load %arg2[%c0, %c0_0] : memref<128x36xf32, #tpu.memory_space<vmem>>, vector<128x36xf32>
    %c0_1 = arith.constant 0 : index
    %c0_2 = arith.constant 0 : index
    %1 = vector.load %arg3[%c0_1, %c0_2] : memref<36x128xf32, #tpu.memory_space<vmem>>, vector<36x128xf32>
    %cst = arith.constant dense<0.000000e+00> : vector<128x128xf32>
    %2 = tpu.matmul %0, %1, %cst {dimension_numbers = #tpu.dot_dimension_numbers<[1], [0], [0], [1], [0, 0, 1, 1], [], []>} : vector<128x36xf32>, vector<36x128xf32>, vector<128x128xf32> -> vector<128x128xf32>
    %c0_3 = arith.constant 0 : index
    %c0_4 = arith.constant 0 : index
    %3 = vector.load %arg4[%c0_3, %c0_4] : memref<1x128xf32, #tpu.memory_space<vmem>>, vector<1x128xf32>
    %4 = vector.broadcast %3 : vector<1x128xf32> to vector<128x128xf32>
    %5 = arith.addf %2, %4 : vector<128x128xf32>
    %cst_5 = arith.constant 0.000000e+00 : f32
    %6 = vector.broadcast %cst_5 : f32 to vector<128x128xf32>
    %7 = arith.maximumf %5, %6 : vector<128x128xf32>
    %c0_6 = arith.constant 0 : index
    %c0_7 = arith.constant 0 : index
    %8 = vector.load %arg5[%c0_6, %c0_7] : memref<128x128xf32, #tpu.memory_space<vmem>>, vector<128x128xf32>
    tpu.vector_store %arg5[%c0_6, %c0_7], %7 {strides = array<i32>} : memref<128x128xf32, #tpu.memory_space<vmem>>, vector<128x128xf32>,
    return
  }
  func.func @transform_0(%arg0: i32, %arg1: i32) -> (i32, i32) {
    %c0_i32 = arith.constant 0 : i32
    %c0_i32_0 = arith.constant 0 : i32
    return %arg0, %c0_i32 : i32, i32
  }
  func.func @transform_1(%arg0: i32, %arg1: i32) -> (i32, i32) {
    %c0_i32 = arith.constant 0 : i32
    %c0_i32_0 = arith.constant 0 : i32
    return %c0_i32, %arg1 : i32, i32
  }
  func.func @transform_2(%arg0: i32, %arg1: i32) -> (i32, i32) {
    %c0_i32 = arith.constant 0 : i32
    %c0_i32_0 = arith.constant 0 : i32
    return %c0_i32, %arg1 : i32, i32
  }
  func.func @transform_3(%arg0: i32, %arg1: i32) -> (i32, i32) {
    %c0_i32 = arith.constant 0 : i32
    return %arg0, %arg1 : i32, i32
  }
}

</mosaic_0001>

<bundles_post_ra>
// kernel: tpu_custom_call.1
= control target key start
LH: loop header
LB: loop body
LE: loop exit
PB: predicated region body
PF: predicated region fallthrough
CT: control target
= control target key end

     0   :  { %8 = vsyncpa [#allocation3], 0  ;;  %s1045_s0 = inlined_call_operand.vmem [shape: f32[512,36], index: 0, kind: input, shape index: {}]   ;;  %s1046_s1 = inlined_call_operand.vmem [shape: f32[36,128], index: 1, kind: input, shape index: {}]   ;;  %s1047_s2 = inlined_call_operand.vmem [shape: f32[1,128], index: 2, kind: input, shape index: {}]   ;;  %s1048_s3 = inlined_call_operand.hbm [shape: f32[512,128], index: 3, kind: output, shape index: {}]  }
   0x1   :  { %10 = vsyncpa [#allocation3 + $0x1], 0  ;;  %s852_s12 = smov 0   ;;  %s854_s13 = smov 0  }
   0x2   :  { %s856_s14 = smov 0   ;;  %s858_s15 = smov 0  }
   0x3   :  { %s860_s16 = smov 0   ;;  %s862_s17 = smov 0  }
   0x4 LB: > { %s589_s18 = sadd.s32 4294967295, %s827_s17   ;;  %s590_s19 = sadd.s32 4294967294, %s827_s17   ;;  %s827_s17 = sphi %s862_s17, %s16_s17   ;;  %s823_s16 = sphi %s860_s16, %s1055_s16   ;;  %s819_s15 = sphi %s858_s15, %s1054_s15   ;;  %s815_s14 = sphi %s856_s14, %s1053_s14   ;;  %s811_s13 = sphi %s854_s13, %s1052_s13   ;;  %s807_s12 = sphi %s852_s12, %s1051_s12  }
   0x5   : > { %s28_s20 = sadd.s32 1, %s823_s16  ;;  %s115_s21 = sadd.s32 1, %s815_s14 }
   0x6   : > { %p30_p0 = scmp.ge.s32.totalorder %s28_s20, 4  ;;  %p125_p1 = scmp.ne.s32.totalorder %s815_s14, %s811_s13 }
   0x7   : > { %p126_p2 = scmp.eq.s32.totalorder %s589_s18, 3  ;;  %p131_p3 = scmp.ne.s32.totalorder %s811_s13, %s807_s12 }
   0x8   : > { %s1057_s20 = smov (%p30_p0, %s28_s20), 0  ;;  %p132_p5 = scmp.eq.s32.totalorder %s590_s19, 3 }
   0x9   : > { %p892_p4 = por %p126_p2, %p125_p1  ;;  %s110_s23 = ssub.s32 %s823_s16, %s1057_s20 }
   0xa   : > { %p595_p6 = scmp.ge.s32.totalorder %s827_s17, 1  ;;  %p113_p7 = scmp.eq.s32.totalorder %s110_s23, 0 }
   0xb   : > { %p899_p8 = por %p132_p5, %p131_p3  ;;  %p172_p9 = scmp.lt.s32.totalorder %s827_s17, 5 }
   0xc   : > { %s905_s25 = scalar_select %p113_p7, %s815_s14, %s115_s21  }
   0xd   : > { %p173_p10 = pnand %p595_p6, %p172_p9 }
   0xe   : > { %v233_v0 = vld [vmem:[%s1046_s1] sm:$0xff] (!%p173_p10)  ;;  %v234_v1 = vld [vmem:[%s1046_s1 + $0x8] sm:$0xff] (!%p173_p10)  ;;  %v235_v2 = vld [vmem:[%s1046_s1 + $0x10] sm:$0xff] (!%p173_p10)  ;;  %s597_s5 = sshll.u32 (!%p173_p10), %s819_s15, 4  ;;  %vm294_vm0 = vcmask (!%p173_p10), 1043456   ;;  %vm245_vm1 = vcmask (!%p173_p10), 293888  }
   0xf   : > { %176 = sbr.rel (%p173_p10) target bundleno = 272 (0x110), region = 32  ;;  %v678_v3 = vpack.c.bf16 (!%p173_p10), %v234_v1, %v233_v0  ;;  %v236_v4 = vld [vmem:[%s1046_s1 + $0x18] sm:$0xff] (!%p173_p10)  ;;  %p204_p11 = scmp.lt.s32.totalorder (!%p173_p10), %s597_s5, 63  ;;  %v237_v6 = vld [vmem:[%s1046_s1 + $0x20] sm:$0xf] (!%p173_p10) }
  0x10   : > { %v682_v5 = vpack.c.bf16 (!%p173_p10), %v236_v4, %v235_v2  ;;  %s200_s21 = sand.u32 (!%p173_p10), 1, %s811_s13   ;;  %v599_v23 = vld [vmem:[%s1047_s2] ss:$0 sm:$0xff] (!%p173_p10)  ;;  %s622_s29 = sshll.u32 (!%p173_p10), %s819_s15, 11 }
  0x11   : > { %679 = vmatprep.subr.bf16.mxu0 (!%p173_p10), %v678_v3  ;;  %686 = vmatprep.subr.bf16.mxu1 (!%p173_p10), %v678_v3  ;;  %s596_s27 = sshll.u32 (!%p173_p10), %s200_s21, 7  ;;  %s999_s6 = scalar_lea.sflag (!%p173_p10), [#allocation3], %s200_s21 }
  0x12   : > { %681 = vmatpush3.bf16.msra.mxu0 (!%p173_p10), %v678_v3  ;;  %689 = vmatpush3.bf16.msra.mxu1 (!%p173_p10), %v678_v3  ;;  %s970_s28 = scalar_lea.vmem (!%p173_p10), [#allocation2], %s596_s27 }
  0x13   : > { %683 = vmatprep.subr.bf16.mxu0 (!%p173_p10), %v682_v5  ;;  %687 = vmatprep.subr.bf16.mxu1 (!%p173_p10), %v682_v5  ;;  %s490_s30 = sshll.u32 (!%p173_p10), %s970_s28, 4  ;;  %s991_s30 = int_to_ptr.vmem [resolvable:$true] %s490_s30 }
  0x14   : > { %s749_s7 = scalar_lea.vmem (!%p173_p10), %s991_s30, 2048 }
  0x15   : > { %p750_p12 = scmp.ne.s32.totalorder (!%p173_p10), %s991_s30, %s749_s7 }
  0x16   : > { %s1059_s5 = smov (!%p204_p11, %s597_s5), 63  ;;  %685 = vmatpush3.bf16.msra.mxu0 %v682_v5  ;;  %690 = vmatpush3.bf16.msra.mxu1 %v682_v5 }
  0x17   : > { %s598_s8 = sshll.u32 %s1059_s5, 3  ;;  %652 = vmatprep.subr.msk.mxu0 %vm294_vm0, %v237_v6  ;;  %688 = vmatprep.subr.msk.mxu1 %vm294_vm0, %v237_v6  ;;  %s989_s5 = scalar_lea.hbm %s1048_s3, %s622_s29 }
  0x18   : > { %s926_s19 = scalar_lea.vmem %s1045_s0, %s598_s8  ;;  %p751_p13 = pnand %p750_p12, %p892_p4 }
  0x19   : > { %v217_v7 = vld [vmem:[%s926_s19] sm:$0xff]  ;;  %v218_v9 = vld [vmem:[%s926_s19 + $0x8] sm:$0xff]  ;;  %v219_v11 = vld [vmem:[%s926_s19 + $0x10] sm:$0xff]  ;;  %s829_s8 = smov [#allocation2]  }
  0x1a   : > { %v225_v8 = vld [vmem:[%s926_s19 + $0x40] sm:$0xff]  ;;  %654 = vmatprep.mubr.msk.f32.mxu0 %vm245_vm1, %v217_v7  ;;  %v226_v10 = vld [vmem:[%s926_s19 + $0x48] sm:$0xff]  ;;  %v227_v12 = vld [vmem:[%s926_s19 + $0x50] sm:$0xff]  ;;  %653 = vmatpush3.msk.msra.mxu0 %vm294_vm0, %v237_v6  ;;  %p752_p0 = pneg %p751_p13  ;;  %s753_s9 = sshll.u32 %s829_s8, 4  ;;  %s754_s9 = int_to_ptr.vmem [resolvable:$false] %s753_s9 }
  0x1b   : > { %666 = vmatprep.mubr.msk.f32.mxu1 %vm245_vm1, %v225_v8  ;;  %691 = vmatpush3.msk.msra.mxu1 %vm294_vm0, %v237_v6  ;;  %v220_v13 = vld [vmem:[%s926_s19 + $0x18] sm:$0xff]  ;;  %v221_v15 = vld [vmem:[%s926_s19 + $0x20] sm:$0xff]  ;;  %v222_v17 = vld [vmem:[%s926_s19 + $0x28] sm:$0xff]  ;;  %s755_s10 = scalar_lea.vmem %s754_s9, 4096  ;;  %p756_p1 = scmp.lt.s32.totalorder %s991_s30, %s754_s9 }
  0x1c   : > { %655 = vmatmul.mubr.msk.f32.vlgmr.msra.gmra.mrb[0].mxu0 %vm245_vm1, %v218_v9  ;;  %667 = vmatmul.mubr.msk.f32.vlgmr.msra.gmra.mrb[0].mxu1 %vm245_vm1, %v226_v10  ;;  %v228_v14 = vld [vmem:[%s926_s19 + $0x58] sm:$0xff]  ;;  %v229_v16 = vld [vmem:[%s926_s19 + $0x60] sm:$0xff]  ;;  %v230_v18 = vld [vmem:[%s926_s19 + $0x68] sm:$0xff]  ;;  %p757_p2 = scmp.lt.s32.totalorder %s755_s10, %s749_s7 }
  0x1d   : > { %657 = vmatprep.mubr.msk.f32.mxu0 %vm245_vm1, %v219_v11  ;;  %669 = vmatprep.mubr.msk.f32.mxu1 %vm245_vm1, %v227_v12  ;;  %v223_v19 = vld [vmem:[%s926_s19 + $0x30] sm:$0xff]  ;;  %v224_v21 = vld [vmem:[%s926_s19 + $0x38] sm:$0xff] }
  0x1e   : > { %v231_v20 = vld [vmem:[%s926_s19 + $0x70] sm:$0xff]  ;;  %v232_v22 = vld [vmem:[%s926_s19 + $0x78] sm:$0xff]  ;;  %p758_p3 = por %p757_p2, %p756_p1 }
  0x20   : > { %658 = vmatmul.mubr.msk.f32.gmra.mrb[2].mxu0 %vm245_vm1, %v220_v13  ;;  %670 = vmatmul.mubr.msk.f32.gmra.mrb[2].mxu1 %vm245_vm1, %v228_v14  ;;  %p759_p5 = pnand %p758_p3, %p752_p0 }
  0x21   : > { %660 = vmatprep.mubr.msk.f32.mxu0 %vm245_vm1, %v221_v15  ;;  %672 = vmatprep.mubr.msk.f32.mxu1 %vm245_vm1, %v229_v16 }
  0x24   : > { %661 = vmatmul.mubr.msk.f32.gmra.mrb[4].mxu0 %vm245_vm1, %v222_v17  ;;  %673 = vmatmul.mubr.msk.f32.gmra.mrb[4].mxu1 %vm245_vm1, %v230_v18 }
  0x25   : > { %663 = vmatprep.mubr.msk.f32.mxu0 %vm245_vm1, %v223_v19  ;;  %675 = vmatprep.mubr.msk.f32.mxu1 %vm245_vm1, %v231_v20 }
  0x28   : > { %664 = vmatmul.mubr.msk.f32.gmra.mrb[6].mxu0 %vm245_vm1, %v224_v21  ;;  %676 = vmatmul.mubr.msk.f32.gmra.mrb[6].mxu1 %vm245_vm1, %v232_v22 }
  0xef   : > { %v656_v24 = vpop.f32.mrb[0].mxu0  ;;  %v668_v25 = vpop.f32.mrb[0].mxu1 }
  0xf0   : > { %v370_v26 = vadd.f32 %v656_v24, %v599_v23  ;;  %v410_v27 = vadd.f32 %v668_v25, %v599_v23  ;;  %v364_v28 = vpop.f32.mrb[1].mxu0  ;;  %v404_v29 = vpop.f32.mrb[1].mxu1 }
  0xf1   : > { %v365_v30 = vadd.f32 %v599_v23, %v364_v28  ;;  %v405_v31 = vadd.f32 %v599_v23, %v404_v29 }
  0xf2   : > { %v444_v32 = vmax.f32 %v370_v26, 0.0  ;;  %v452_v33 = vmax.f32 %v410_v27, 0.0 }
  0xf3   : > { %v443_v34 = vmax.f32 %v365_v30, 0.0  ;;  %v451_v35 = vmax.f32 %v405_v31, 0.0  ;;  %v659_v36 = vpop.f32.mrb[2].mxu0  ;;  %v671_v37 = vpop.f32.mrb[2].mxu1 }
  0xf4   : > { %460 = vst [vmem:[%s970_s28 + $0x8] sm:$0xff] %v444_v32  ;;  %468 = vst [vmem:[%s970_s28 + $0x48] sm:$0xff] %v452_v33  ;;  %v380_v38 = vadd.f32 %v659_v36, %v599_v23  ;;  %v420_v39 = vadd.f32 %v671_v37, %v599_v23  ;;  %v374_v40 = vpop.f32.mrb[3].mxu0  ;;  %v414_v41 = vpop.f32.mrb[3].mxu1 }
  0xf5   : > { %459 = vst [vmem:[%s970_s28] sm:$0xff] %v443_v34  ;;  %467 = vst [vmem:[%s970_s28 + $0x40] sm:$0xff] %v451_v35  ;;  %v375_v42 = vadd.f32 %v599_v23, %v374_v40  ;;  %v415_v43 = vadd.f32 %v599_v23, %v414_v41 }
  0xf6   : > { %v446_v44 = vmax.f32 %v380_v38, 0.0  ;;  %v454_v45 = vmax.f32 %v420_v39, 0.0 }
  0xf7   : > { %v445_v46 = vmax.f32 %v375_v42, 0.0  ;;  %v453_v47 = vmax.f32 %v415_v43, 0.0  ;;  %v662_v48 = vpop.f32.mrb[4].mxu0  ;;  %v674_v49 = vpop.f32.mrb[4].mxu1 }
  0xf8   : > { %462 = vst [vmem:[%s970_s28 + $0x18] sm:$0xff] %v446_v44  ;;  %470 = vst [vmem:[%s970_s28 + $0x58] sm:$0xff] %v454_v45  ;;  %v390_v50 = vadd.f32 %v662_v48, %v599_v23  ;;  %v430_v51 = vadd.f32 %v674_v49, %v599_v23  ;;  %v384_v52 = vpop.f32.mrb[5].mxu0  ;;  %v424_v53 = vpop.f32.mrb[5].mxu1 }
  0xf9   : > { %461 = vst [vmem:[%s970_s28 + $0x10] sm:$0xff] %v445_v46  ;;  %469 = vst [vmem:[%s970_s28 + $0x50] sm:$0xff] %v453_v47  ;;  %v385_v54 = vadd.f32 %v599_v23, %v384_v52  ;;  %v425_v55 = vadd.f32 %v599_v23, %v424_v53 }
  0xfa   : > { %v448_v56 = vmax.f32 %v390_v50, 0.0  ;;  %v456_v57 = vmax.f32 %v430_v51, 0.0 }
  0xfb   : > { %v447_v58 = vmax.f32 %v385_v54, 0.0  ;;  %v455_v59 = vmax.f32 %v425_v55, 0.0  ;;  %v665_v60 = vpop.f32.mrb[6].mxu0  ;;  %v677_v61 = vpop.f32.mrb[6].mxu1 }
  0xfc   : > { %464 = vst [vmem:[%s970_s28 + $0x28] sm:$0xff] %v448_v56  ;;  %472 = vst [vmem:[%s970_s28 + $0x68] sm:$0xff] %v456_v57  ;;  %v400_v62 = vadd.f32 %v665_v60, %v599_v23  ;;  %v440_v63 = vadd.f32 %v677_v61, %v599_v23  ;;  %v394_v0 = vpop.f32.mrb[7].mxu0  ;;  %v434_v1 = vpop.f32.mrb[7].mxu1 }
  0xfd   : > { %463 = vst [vmem:[%s970_s28 + $0x20] sm:$0xff] %v447_v58  ;;  %471 = vst [vmem:[%s970_s28 + $0x60] sm:$0xff] %v455_v59  ;;  %v395_v2 = vadd.f32 %v599_v23, %v394_v0  ;;  %v435_v3 = vadd.f32 %v599_v23, %v434_v1 }
  0xfe   : > { %v450_v4 = vmax.f32 %v400_v62, 0.0  ;;  %v458_v5 = vmax.f32 %v440_v63, 0.0 }
  0xff   : > { %v449_v6 = vmax.f32 %v395_v2, 0.0  ;;  %v457_v7 = vmax.f32 %v435_v3, 0.0 }
 0x100   : > { %466 = vst [vmem:[%s970_s28 + $0x38] sm:$0xff] %v450_v4  ;;  %474 = vst [vmem:[%s970_s28 + $0x78] sm:$0xff] %v458_v5 }
 0x101   : > { %465 = vst [vmem:[%s970_s28 + $0x30] sm:$0xff] %v449_v6  ;;  %473 = vst [vmem:[%s970_s28 + $0x70] sm:$0xff] %v457_v7 }
 0x102   : > { %762 = shalt.err (!%p759_p5)
}
 0x103   : > { %s763_s11 = scalar_lea.hbm %s989_s5, 2048  ;;  %s767_s21 = scalar_lea.hbm %s1048_s3, 8192 }
 0x104   : > { %p764_p6 = scmp.ne.s32.totalorder %s989_s5, %s763_s11  ;;  %p768_p10 = scmp.lt.u32.totalorder %s989_s5, %s1048_s3 }
 0x105   : > { %p769_p11 = scmp.lt.u32.totalorder %s767_s21, %s763_s11  ;;  %p771_p13 = scmp.lt.u32.totalorder %s763_s11, %s989_s5 }
 0x106   : > { %p765_p7 = pnand %p764_p6, %p892_p4 }
 0x107   : > { %p770_p12 = por %p769_p11, %p768_p10 }
 0x108   : > { %p766_p9 = pneg %p765_p7 }
 0x109   : > { %p772_p0 = por %p771_p13, %p770_p12 }
 0x10b   : > { %p773_p1 = pnand %p772_p0, %p766_p9 }
 0x10d   : > { %776 = shalt.err (!%p773_p1)
}
 0x10e   : > { %s830_s27 = smov 128   ;;  %s831_s28 = smov 8  }
 0x10f   : > { %692 = dma.vmem_to_hbm [thread:$0]  (%p892_p4), %s991_s30, 2048, %s989_s5, %s999_s6, %s830_s27, %s830_s27, %s831_s28  }
 0x110 PF: > { %p698_p2 = scmp.ge.s32.totalorder %s827_s17, 2  ;;  %s505_s29 = sand.u32 1, %s807_s12  }
 0x111   : > { %s506_s15 = scalar_lea.sflag [#allocation3], %s505_s29 }
 0x112   : > { %p695_p3 = pnand %p698_p2, %p899_p8 }
 0x114   : > { %802 = dma.done.wait (!%p695_p3), %s506_s15, 2048  }
 0x115   : > { %804 = vsyncadd (!%p695_p3), %s506_s15, 4294965248  ;;  %s16_s17 = sadd.s32 1, %s827_s17   ;;  %s1051_s12 = smov %s811_s13 }
 0x116   : > { %p13_p5 = scmp.ge.s32.totalorder %s16_s17, 6   ;;  %s1052_s13 = smov %s815_s14 }
 0x117   : > { %s1053_s14 = smov %s905_s25  ;;  %s1054_s15 = smov %s823_s16 }
 0x118   : > { %s1055_s16 = smov %s1057_s20  ;;  %15 = sbr.rel (!%p13_p5) target bundleno = 4 (0x4), region = 73 }
 0x11f   :  { %511 = vsyncpa [#allocation3], 1 }
 0x120   :  { %513 = vsyncpa [#allocation3 + $0x1], 1 }

</bundles_post_ra>
